<compile_context>
chip_gen: v6e
topology: v6e:2x2x1
jax: 0.10.0
libtpu: 0.0.40
codegen_flags: <defaults>
</compile_context>

<pallas_src>
import numpy as np
import jax
import jax.numpy as jnp
from jax.experimental import pallas as pl
from jax.experimental.pallas import tpu as pltpu

LEN_FEATURE = 512   # hardcoded in the PyTorch module
TK = 512            # contraction-dimension tile


def _sggnn_kernel(dx_ref, w_ref, feat_ref, adj_ref, acc_ref):
    k = pl.program_id(0)

    @pl.when(k == 0)
    def _init():
        acc_ref[...] = jnp.zeros_like(acc_ref)

    # Single projection matmul per K-tile, accumulated in f32:
    #   acc += (x_p - x_g)[:, k-tile] @ w[k-tile, :]
    acc_ref[...] += jnp.dot(dx_ref[...], w_ref[...],
                            preferred_element_type=jnp.float32)

    @pl.when(k == pl.num_programs(0) - 1)
    def _finalize():
        proj = acc_ref[...]                       # (B, F) f32
        feat = proj * proj                        # pair feature: (fp - fg)^2

        # --- self.normalize(feature): row-normalize, 1/0 -> 0 ---
        rs = jnp.sum(feat, axis=-1, keepdims=True)            # (B, 1)
        rinv = jnp.where(rs == 0.0, 0.0, pl.reciprocal(rs, approx=True))
        feat = feat * rinv
        feat_ref[...] = feat

        # --- adjacency: pairwise squared L2 via Gram matrix ---
        #   d[i,j] = ||f_i||^2 + ||f_j||^2 - 2 <f_i, f_j>
        gram = jax.lax.dot_general(
            feat, feat, (((1,), (1,)), ((), ())),
            preferred_element_type=jnp.float32)                # (B, B)
        b = gram.shape[0]
        ii = jax.lax.broadcasted_iota(jnp.int32, (b, b), 0)
        jj = jax.lax.broadcasted_iota(jnp.int32, (b, b), 1)
        diag = ii == jj
        diag_g = jnp.where(diag, gram, 0.0)
        sq_col = jnp.sum(diag_g, axis=1, keepdims=True)        # (B,1)  ||f_i||^2
        sq_row = jnp.sum(diag_g, axis=0, keepdims=True)        # (1,B)  ||f_j||^2
        d = sq_col + sq_row - 2.0 * gram
        d = jnp.maximum(d, 0.0)                  # clamp fp cancellation
        d = jnp.where(diag, 0.0, d)              # exact zeros on the diagonal

        # torch symmetrization == elementwise max(adj, adj.T); d is symmetric
        # by construction, so it is an identity and omitted.

        # --- self.normalize(adj + I) ---
        adj = d + jnp.where(diag, 1.0, 0.0)
        ars = jnp.sum(adj, axis=-1, keepdims=True)             # (B, 1)
        arinv = jnp.where(ars == 0.0, 0.0, pl.reciprocal(ars, approx=True))
        adj_ref[...] = adj * arinv


def _sggnn_prepare_call(dx, w):
    B, D = dx.shape
    F = w.shape[1]
    n_k = D // TK  # caller pads D to a multiple of TK
    feature, adj = pl.pallas_call(
        _sggnn_kernel,
        grid=(n_k,),
        out_shape=(
            jax.ShapeDtypeStruct((B, F), jnp.float32),
            jax.ShapeDtypeStruct((B, B), jnp.float32),
        ),
        in_specs=[
            pl.BlockSpec((B, TK), lambda k: (0, k)),
            pl.BlockSpec((TK, F), lambda k: (k, 0)),
        ],
        out_specs=(
            pl.BlockSpec((B, F), lambda k: (0, 0)),
            pl.BlockSpec((B, B), lambda k: (0, 0)),
        ),
        scratch_shapes=[pltpu.VMEM((B, F), jnp.float32)],
        compiler_params=pltpu.CompilerParams(
            dimension_semantics=("arbitrary",)),
    )(dx, w)
    return adj, feature


def sggnn_prepare(x, y, w):
    """Mirrors Sggnn_prepare.forward.

    x : (B, 2, C, H, W) float32  -- [:,0] probe images, [:,1] gallery images
    y : (B, 2) int32             -- [:,0] probe labels, [:,1] gallery labels
    w : (C*H*W, 512) float32     -- synthetic basemodel projection weight
    returns (adj (B,B) f32, feature (B,512) f32, label (B,) i32)
    """
    B = x.shape[0]
    x_p, x_g = x[:, 0], x[:, 1]
    y_p, y_g = y[:, 0], y[:, 1]

    # --- host-side random pairing / shuffling (mirrors the numpy logic) ---
    pair_num = np.random.randint(int(B * 0.4), int(B * 0.6))
    index = np.arange(B)
    np.random.shuffle(index[pair_num:])       # shuffles the view in place
    x_g = x_g[index]
    y_g = y_g[index]
    index = np.random.permutation(B)
    x_p = x_p[index]
    x_g = x_g[index]
    y_p = y_p[index]
    y_g = y_g[index]

    # label = where(y_p == y_g, 1, 0)
    label = jnp.where(y_p == y_g, 1, 0).astype(jnp.int32)

    D = int(np.prod(x_p.shape[1:]))
    # feat = (xp@w - xg@w)^2 == ((xp - xg)@w)^2 : fold to a single matmul and
    # a single (B, D) kernel input (half the input DMA, half the MXU work).
    dx = (x_p.reshape(B, D).astype(jnp.float32)
          - x_g.reshape(B, D).astype(jnp.float32))

    # pad contraction dim to a multiple of TK (zero rows don't change the matmul)
    D_pad = ((D + TK - 1) // TK) * TK
    w_in = w
    if D_pad != D:
        dx = jnp.pad(dx, ((0, 0), (0, D_pad - D)))
        w_in = jnp.pad(w, ((0, D_pad - D), (0, 0)))

    # bf16 halves the dominant HBM weight stream; accumulation stays f32.
    dx = dx.astype(jnp.bfloat16)
    w_in = w_in.astype(jnp.bfloat16)

    adj, feature = _sggnn_prepare_call(dx, w_in)
    return adj, feature, label


if __name__ == "__main__":
    np.random.seed(0)
    key = jax.random.PRNGKey(0)
    kx, ky, kw = jax.random.split(key, 3)

    B, C, H, W = 8, 4, 16, 16
    x = jax.random.normal(kx, (B, 2, C, H, W), dtype=jnp.float32)
    y = jax.random.randint(ky, (B, 2), 0, 4, dtype=jnp.int32)
    # deterministic synthetic basemodel projection weight
    w = (jax.random.normal(kw, (C * H * W, LEN_FEATURE), dtype=jnp.float32)
         * 0.02)

    adj, feature, label = sggnn_prepare(x, y, w)
    jax.block_until_ready((adj, feature, label))

    assert adj.shape == (B, B) and feature.shape == (B, LEN_FEATURE)
    assert label.shape == (B,)
    # sanity: row sums of normalized adjacency should be ~1
    assert np.allclose(np.asarray(jnp.sum(adj, axis=-1)), 1.0, atol=1e-2)
    print("KERNEL_OK")
</pallas_src>

<mosaic_0001>
module attributes {stable_mosaic.version = 11 : i64} {
  func.func @_sggnn_kernel(%arg0: i32, %arg1: memref<8x512xbf16, #tpu.memory_space<vmem>>, %arg2: memref<512x512xbf16, #tpu.memory_space<vmem>>, %arg3: memref<8x512xf32, #tpu.memory_space<vmem>>, %arg4: memref<8x8xf32, #tpu.memory_space<vmem>>, %arg5: memref<8x512xf32, #tpu.memory_space<vmem>>) attributes {dimension_semantics = [#tpu.dimension_semantics<arbitrary>], iteration_bounds = array<i64: 2>, scalar_prefetch = 0 : i64, scratch_operands = 1 : i64, tpu.core_type = #tpu.core_type<tc>, window_params = [{transform_indices = @transform_0, window_bounds = array<i64: 8, 512>}, {transform_indices = @transform_1, window_bounds = array<i64: 512, 512>}, {pipeline_mode = #tpu.pipeline_mode<synchronous>, transform_indices = @transform_2, window_bounds = array<i64: 8, 512>}, {pipeline_mode = #tpu.pipeline_mode<synchronous>, transform_indices = @transform_3, window_bounds = array<i64: 8, 8>}]} {
    %c0_i32 = arith.constant 0 : i32
    %0 = arith.cmpi eq, %arg0, %c0_i32 : i32
    %1 = arith.extui %0 : i1 to i32
    %c0_i32_0 = arith.constant 0 : i32
    %2 = arith.cmpi ne, %1, %c0_i32_0 : i32
    scf.if %2 {
      %cst_9 = arith.constant 0.000000e+00 : f32
      %12 = vector.broadcast %cst_9 : f32 to vector<8x512xf32>
      %c0_10 = arith.constant 0 : index
      %c0_11 = arith.constant 0 : index
      %13 = vector.load %arg5[%c0_10, %c0_11] : memref<8x512xf32, #tpu.memory_space<vmem>>, vector<8x512xf32>
      tpu.vector_store %arg5[%c0_10, %c0_11], %12 {strides = array<i32>} : memref<8x512xf32, #tpu.memory_space<vmem>>, vector<8x512xf32>,
    } else {
    }
    %c0 = arith.constant 0 : index
    %c0_1 = arith.constant 0 : index
    %3 = vector.load %arg5[%c0, %c0_1] : memref<8x512xf32, #tpu.memory_space<vmem>>, vector<8x512xf32>
    %c0_2 = arith.constant 0 : index
    %c0_3 = arith.constant 0 : index
    %4 = vector.load %arg1[%c0_2, %c0_3] : memref<8x512xbf16, #tpu.memory_space<vmem>>, vector<8x512xbf16>
    %c0_4 = arith.constant 0 : index
    %c0_5 = arith.constant 0 : index
    %5 = vector.load %arg2[%c0_4, %c0_5] : memref<512x512xbf16, #tpu.memory_space<vmem>>, vector<512x512xbf16>
    %cst = arith.constant dense<0.000000e+00> : vector<8x512xf32>
    %6 = tpu.matmul %4, %5, %cst {dimension_numbers = #tpu.dot_dimension_numbers<[1], [0], [0], [1], [0, 0, 1, 1], [], []>} : vector<8x512xbf16>, vector<512x512xbf16>, vector<8x512xf32> -> vector<8x512xf32>
    %7 = arith.addf %3, %6 : vector<8x512xf32>
    %c0_6 = arith.constant 0 : index
    %c0_7 = arith.constant 0 : index
    %8 = vector.load %arg5[%c0_6, %c0_7] : memref<8x512xf32, #tpu.memory_space<vmem>>, vector<8x512xf32>
    tpu.vector_store %arg5[%c0_6, %c0_7], %7 {strides = array<i32>} : memref<8x512xf32, #tpu.memory_space<vmem>>, vector<8x512xf32>,
    %c1_i32 = arith.constant 1 : i32
    %9 = arith.cmpi eq, %arg0, %c1_i32 : i32
    %10 = arith.extui %9 : i1 to i32
    %c0_i32_8 = arith.constant 0 : i32
    %11 = arith.cmpi ne, %10, %c0_i32_8 : i32
    scf.if %11 {
      %c0_9 = arith.constant 0 : index
      %c0_10 = arith.constant 0 : index
      %12 = vector.load %arg5[%c0_9, %c0_10] : memref<8x512xf32, #tpu.memory_space<vmem>>, vector<8x512xf32>
      %13 = arith.mulf %12, %12 : vector<8x512xf32>
      %cst_11 = arith.constant dense<0.000000e+00> : vector<8xf32>
      %14 = vector.multi_reduction <add>, %13, %cst_11 [1] : vector<8x512xf32> to vector<8xf32>
      %15 = vector.shape_cast %14 : vector<8xf32> to vector<8x1xf32>
      %cst_12 = arith.constant 0.000000e+00 : f32
      %16 = vector.broadcast %cst_12 : f32 to vector<8x1xf32>
      %17 = arith.cmpf oeq, %15, %16 : vector<8x1xf32>
      %18 = tpu.reciprocal %15 {approx = true} : vector<8x1xf32> -> vector<8x1xf32>
      %cst_13 = arith.constant 0.000000e+00 : f32
      %19 = vector.broadcast %cst_13 : f32 to vector<8x1xf32>
      %20 = arith.select %17, %19, %18 : vector<8x1xi1>, vector<8x1xf32>
      %21 = vector.broadcast %20 : vector<8x1xf32> to vector<8x512xf32>
      %22 = arith.mulf %13, %21 : vector<8x512xf32>
      %c0_14 = arith.constant 0 : index
      %c0_15 = arith.constant 0 : index
      %23 = vector.load %arg3[%c0_14, %c0_15] : memref<8x512xf32, #tpu.memory_space<vmem>>, vector<8x512xf32>
      tpu.vector_store %arg3[%c0_14, %c0_15], %22 {strides = array<i32>} : memref<8x512xf32, #tpu.memory_space<vmem>>, vector<8x512xf32>,
      %cst_16 = arith.constant dense<0.000000e+00> : vector<8x8xf32>
      %24 = tpu.matmul %22, %22, %cst_16 {dimension_numbers = #tpu.dot_dimension_numbers<[1], [1], [0], [0], [0, 0, 1, 0], [], []>} : vector<8x512xf32>, vector<8x512xf32>, vector<8x8xf32> -> vector<8x8xf32>
      %25 = tpu.iota {dimensions = array<i32: 0>} : vector<8x8xi32>
      %26 = tpu.iota {dimensions = array<i32: 1>} : vector<8x8xi32>
      %27 = arith.cmpi eq, %25, %26 : vector<8x8xi32>
      %cst_17 = arith.constant 0.000000e+00 : f32
      %28 = vector.broadcast %cst_17 : f32 to vector<8x8xf32>
      %29 = arith.select %27, %24, %28 : vector<8x8xi1>, vector<8x8xf32>
      %cst_18 = arith.constant dense<0.000000e+00> : vector<8xf32>
      %30 = vector.multi_reduction <add>, %29, %cst_18 [1] : vector<8x8xf32> to vector<8xf32>
      %31 = vector.shape_cast %30 : vector<8xf32> to vector<8x1xf32>
      %cst_19 = arith.constant dense<0.000000e+00> : vector<8xf32>
      %32 = vector.multi_reduction <add>, %29, %cst_19 [0] : vector<8x8xf32> to vector<8xf32>
      %33 = vector.shape_cast %32 : vector<8xf32> to vector<1x8xf32>
      %34 = vector.broadcast %31 : vector<8x1xf32> to vector<8x8xf32>
      %35 = vector.broadcast %33 : vector<1x8xf32> to vector<8x8xf32>
      %36 = arith.addf %34, %35 : vector<8x8xf32>
      %cst_20 = arith.constant 2.000000e+00 : f32
      %37 = vector.broadcast %cst_20 : f32 to vector<8x8xf32>
      %38 = arith.mulf %37, %24 : vector<8x8xf32>
      %39 = arith.subf %36, %38 : vector<8x8xf32>
      %cst_21 = arith.constant 0.000000e+00 : f32
      %40 = vector.broadcast %cst_21 : f32 to vector<8x8xf32>
      %41 = arith.maximumf %39, %40 : vector<8x8xf32>
      %cst_22 = arith.constant 0.000000e+00 : f32
      %42 = vector.broadcast %cst_22 : f32 to vector<8x8xf32>
      %43 = arith.select %27, %42, %41 : vector<8x8xi1>, vector<8x8xf32>
      %cst_23 = arith.constant 1.000000e+00 : f32
      %cst_24 = arith.constant 0.000000e+00 : f32
      %44 = vector.broadcast %cst_23 : f32 to vector<8x8xf32>
      %45 = vector.broadcast %cst_24 : f32 to vector<8x8xf32>
      %46 = arith.select %27, %44, %45 : vector<8x8xi1>, vector<8x8xf32>
      %47 = arith.addf %43, %46 : vector<8x8xf32>
      %cst_25 = arith.constant dense<0.000000e+00> : vector<8xf32>
      %48 = vector.multi_reduction <add>, %47, %cst_25 [1] : vector<8x8xf32> to vector<8xf32>
      %49 = vector.shape_cast %48 : vector<8xf32> to vector<8x1xf32>
      %cst_26 = arith.constant 0.000000e+00 : f32
      %50 = vector.broadcast %cst_26 : f32 to vector<8x1xf32>
      %51 = arith.cmpf oeq, %49, %50 : vector<8x1xf32>
      %52 = tpu.reciprocal %49 {approx = true} : vector<8x1xf32> -> vector<8x1xf32>
      %cst_27 = arith.constant 0.000000e+00 : f32
      %53 = vector.broadcast %cst_27 : f32 to vector<8x1xf32>
      %54 = arith.select %51, %53, %52 : vector<8x1xi1>, vector<8x1xf32>
      %55 = vector.broadcast %54 : vector<8x1xf32> to vector<8x8xf32>
      %56 = arith.mulf %47, %55 : vector<8x8xf32>
      %c0_28 = arith.constant 0 : index
      %c0_29 = arith.constant 0 : index
      %57 = vector.load %arg4[%c0_28, %c0_29] : memref<8x8xf32, #tpu.memory_space<vmem>>, vector<8x8xf32>
      tpu.vector_store %arg4[%c0_28, %c0_29], %56 {strides = array<i32>} : memref<8x8xf32, #tpu.memory_space<vmem>>, vector<8x8xf32>,
    } else {
    }
    return
  }
  func.func @transform_0(%arg0: i32) -> (i32, i32) {
    %c0_i32 = arith.constant 0 : i32
    %c0_i32_0 = arith.constant 0 : i32
    return %c0_i32, %arg0 : i32, i32
  }
  func.func @transform_1(%arg0: i32) -> (i32, i32) {
    %c0_i32 = arith.constant 0 : i32
    %c0_i32_0 = arith.constant 0 : i32
    return %arg0, %c0_i32 : i32, i32
  }
  func.func @transform_2(%arg0: i32) -> (i32, i32) {
    %c0_i32 = arith.constant 0 : i32
    %c0_i32_0 = arith.constant 0 : i32
    %c0_i32_1 = arith.constant 0 : i32
    return %c0_i32, %c0_i32_0 : i32, i32
  }
  func.func @transform_3(%arg0: i32) -> (i32, i32) {
    %c0_i32 = arith.constant 0 : i32
    %c0_i32_0 = arith.constant 0 : i32
    %c0_i32_1 = arith.constant 0 : i32
    return %c0_i32, %c0_i32_0 : i32, i32
  }
}

</mosaic_0001>

<bundles_post_ra>
// kernel: tpu_custom_call.1
= control target key start
LH: loop header
LB: loop body
LE: loop exit
PB: predicated region body
PF: predicated region fallthrough
CT: control target
= control target key end

     0   :  { %9 = vsyncpa [#allocation4], 0  ;;  %s2410_s0 = inlined_call_operand.hbm [shape: bf16[8,1024], index: 0, kind: input, shape index: {}]   ;;  %s2411_s1 = inlined_call_operand.hbm [shape: bf16[1024,512], index: 1, kind: input, shape index: {}]   ;;  %s2412_s2 = inlined_call_operand.hbm [shape: f32[8,512], index: 2, kind: output, shape index: {0}]   ;;  %s2413_s3 = inlined_call_operand.hbm [shape: f32[8,8], index: 3, kind: output, shape index: {1}]  }
   0x1   :  { %11 = vsyncpa [#allocation4 + $0x1], 0 }
   0x2   :  { %12 = vsyncpa [#allocation7], 0 }
   0x3   :  { %14 = vsyncpa [#allocation7 + $0x1], 0 }
   0x4   :  { %15 = vsyncpa [#allocation5], 0 }
   0x5   :  { %16 = vsyncpa [#allocation10], 0  ;;  %s2084_s12 = smov 0   ;;  %s2086_s13 = smov 0  }
   0x6   :  { %s2088_s14 = smov 0   ;;  %s2090_s15 = smov 0  }
   0x7 LB: > { %s2103_s16 = sadd.s32 4294967295, %s2054_s15   ;;  %s2106_s17 = sadd.s32 1, %s2054_s15   ;;  %s2054_s15 = sphi %s2090_s15, %s2424_s15   ;;  %s2050_s14 = sphi %s2088_s14, %s2423_s14   ;;  %s2046_s13 = sphi %s2086_s13, %s2422_s13   ;;  %s2042_s12 = sphi %s2084_s12, %s2421_s12  }
   0x8   : > { %s26_s18 = ssub.s32 %s2054_s15, %s2106_s17  ;;  %s29_s19 = sadd.s32 1, %s2050_s14 }
   0x9   : > { %p27_p0 = scmp.eq.s32.totalorder %s26_s18, 0  ;;  %p36_p1 = scmp.ne.s32.totalorder %s2050_s14, %s2046_s13 }
   0xa   : > { %p37_p2 = scmp.eq.s32.totalorder %s2054_s15, 0  ;;  %p42_p3 = scmp.ne.s32.totalorder %s2046_s13, %s2042_s12 }
   0xb   : > { %s2116_s20 = scalar_select %p27_p0, %s2050_s14, %s29_s19  }
   0xc   : > { %p38_p4 = por %p37_p2, %p36_p1  ;;  %p43_p5 = scmp.eq.s32.totalorder %s2103_s16, 0 }
   0xd   : > { %p1661_p6 = scmp.lt.s32.totalorder %s2054_s15, 2  ;;  %s2125_s22 = sand.u32 1, %s2050_s14  }
   0xe   : > { %p2120_p7 = por %p43_p5, %p42_p3  ;;  %s1489_s23 = sshll.u32 %s2125_s22, 4 }
   0xf   : > { %s1639_s24 = sshll.u32 %s2054_s15, 8  ;;  %s138_s28 = scalar_lea.vmem [#allocation3], %s1489_s23 }
  0x10   : > { %s2415_s21 = scalar_select %p2120_p7, 1, 0 }
  0x11   : > { %s2132_s27 = scalar_lea.hbm %s2410_s0, %s1639_s24  ;;  %s146_s29 = sshll.u32 %s138_s28, 4  ;;  %s2134_s29 = int_to_ptr.vmem [resolvable:$true] %s146_s29 }
  0x12   : > { %p2136_p8 = pnand %p1661_p6, %p38_p4  ;;  %s135_s4 = scalar_lea.sflag [#allocation4], %s2125_s22 }
  0x13   : > { %s1904_s5 = scalar_lea.hbm %s2132_s27, 256  ;;  %s1909_s8 = scalar_lea.hbm %s2410_s0, 512 }
  0x14   : > { %p1905_p11 = scmp.ne.s32.totalorder %s2132_s27, %s1904_s5  ;;  %p1906_p12 = pneg %p2136_p8 }
  0x15   : > { %p1910_p1 = scmp.lt.s32.totalorder %s2132_s27, %s2410_s0  ;;  %p1911_p2 = scmp.lt.s32.totalorder %s1909_s8, %s1904_s5 }
  0x16   : > { %p1907_p13 = pnand %p1906_p12, %p1905_p11 }
  0x17   : > { %p1912_p3 = por %p1911_p2, %p1910_p1 }
  0x18   : > { %p1908_p0 = pneg %p1907_p13 }
  0x1a   : > { %p1913_p4 = pnand %p1912_p3, %p1908_p0 }
  0x1c   : > { %1916 = shalt.err (!%p1913_p4)
}
  0x1d   : > { %s1917_s11 = scalar_lea.vmem %s2134_s29, 256  ;;  %s2056_s12 = smov [#allocation3]  }
  0x1e   : > { %p1918_p5 = scmp.ne.s32.totalorder %s2134_s29, %s1917_s11  ;;  %s1922_s18 = sshll.u32 %s2056_s12, 4  ;;  %s1923_s18 = int_to_ptr.vmem [resolvable:$false] %s1922_s18 }
  0x1f   : > { %s1924_s19 = scalar_lea.vmem %s1923_s18, 512  ;;  %p1925_p13 = scmp.lt.s32.totalorder %s2134_s29, %s1923_s18 }
  0x20   : > { %p1920_p6 = pnand %p1918_p5, %p1906_p12  ;;  %p1926_p9 = scmp.lt.s32.totalorder %s1924_s19, %s1917_s11 }
  0x22   : > { %p1921_p11 = pneg %p1920_p6  ;;  %p1927_p10 = por %p1926_p9, %p1925_p13 }
  0x24   : > { %p1928_p1 = pnand %p1927_p10, %p1921_p11 }
  0x26   : > { %1931 = shalt.err (!%p1928_p1)
}
  0x27   : > { %1657 = dma.hbm_to_vmem [thread:$0]  (!%p2136_p8), %s2132_s27, 256, %s2134_s29, %s135_s4  }
  0x28   : > { %p2417_p0 = scmp.lt.s32.totalorder %s2054_s15, 3  ;;  %p2418_p2 = scmp.ge.s32.totalorder %s2054_s15, 1 }
  0x29   : > { %s1492_s24 = sshll.u32 %s2125_s22, 10  ;;  %s1641_s25 = sshll.u32 %s2054_s15, 14 }
  0x2a   : > { %p2171_p3 = pnand %p2418_p2, %p2417_p0  ;;  %s2180_s5 = scalar_lea.hbm %s2411_s1, %s1641_s25 }
  0x2b   : > { %s157_s6 = scalar_lea.vmem [#allocation6], %s1492_s24  ;;  %s154_s27 = scalar_lea.sflag [#allocation7], %s2125_s22 }
  0x2c   : > { %s165_s7 = sshll.u32 %s157_s6, 4  ;;  %s1932_s29 = scalar_lea.hbm %s2180_s5, 16384  ;;  %s2182_s7 = int_to_ptr.vmem [resolvable:$true] %s165_s7 }
  0x2d   : > { %p1933_p9 = scmp.ne.s32.totalorder %s2180_s5, %s1932_s29  ;;  %s1937_s8 = scalar_lea.hbm %s2411_s1, 32768 }
  0x2e   : > { %p1938_p5 = scmp.lt.s32.totalorder %s2180_s5, %s2411_s1  ;;  %p1939_p6 = scmp.lt.s32.totalorder %s1937_s8, %s1932_s29 }
  0x2f   : > { %p1935_p10 = pnand %p1933_p9, %p1906_p12 }
  0x30   : > { %p1940_p11 = por %p1939_p6, %p1938_p5 }
  0x31   : > { %p1936_p4 = pneg %p1935_p10 }
  0x33   : > { %p1941_p13 = pnand %p1940_p11, %p1936_p4 }
  0x35   : > { %1944 = shalt.err (!%p1941_p13)
}
  0x36   : > { %s1945_s11 = scalar_lea.vmem %s2182_s7, 16384  ;;  %s2057_s12 = smov [#allocation6]  }
  0x37   : > { %p1946_p1 = scmp.ne.s32.totalorder %s2182_s7, %s1945_s11  ;;  %s1950_s18 = sshll.u32 %s2057_s12, 4  ;;  %s1951_s18 = int_to_ptr.vmem [resolvable:$false] %s1950_s18 }
  0x38   : > { %s1952_s19 = scalar_lea.vmem %s1951_s18, 32768  ;;  %p1953_p9 = scmp.lt.s32.totalorder %s2182_s7, %s1951_s18 }
  0x39   : > { %p1948_p0 = pnand %p1946_p1, %p1906_p12  ;;  %p1954_p10 = scmp.lt.s32.totalorder %s1952_s19, %s1945_s11 }
  0x3b   : > { %p1949_p2 = pneg %p1948_p0  ;;  %p1955_p7 = por %p1954_p10, %p1953_p9 }
  0x3d   : > { %p1956_p5 = pnand %p1955_p7, %p1949_p2 }
  0x3f   : > { %1959 = shalt.err (!%p1956_p5)
}
  0x40   : > { %s2058_s24 = smov 256   ;;  %s2059_s25 = smov 16  }
  0x41   : > { %1660 = dma.hbm_to_vmem [thread:$0]  (!%p2136_p8), %s2180_s5, 16384, %s2182_s7, %s154_s27, %s2058_s24, %s2058_s24, %s2059_s25  }
  0x42   : > { %177 = sbr.rel (%p2171_p3) target bundleno = 1115 (0x45b), region = 28  ;;  %s179_s26 = sand.u32 (!%p2171_p3), 1, %s2046_s13  }
  0x43   : > { %s1497_s28 = sshll.u32 (!%p2171_p3), %s179_s26, 4  ;;  %s180_s6 = scalar_lea.sflag (!%p2171_p3), [#allocation4], %s179_s26 }
  0x44   : > { %s2212_s29 = scalar_lea.vmem (!%p2171_p3), [#allocation3], %s1497_s28  ;;  %p2420_p7 = scmp.ne.s32.totalorder (!%p2171_p3), %s2415_s21, 0 }
  0x47   : > { %2025 = dma.done.wait (%p2420_p7), %s180_s6, 256  }
  0x48   : > { %2027 = vsyncadd (%p2420_p7), %s180_s6, 4294967040  ;;  %s1498_s15 = sshll.u32 %s179_s26, 10  ;;  %s189_s30 = scalar_lea.sflag [#allocation7], %s179_s26 }
  0x49   : > { %s2218_s22 = scalar_lea.vmem [#allocation6], %s1498_s15 }
  0x4a   : > { %2029 = dma.done.wait (%p2420_p7), %s189_s30, 16384  }
  0x4b   : > { %2031 = vsyncadd (%p2420_p7), %s189_s30, 4294950912  ;;  %p1499_p8 = scmp.ne.s32.totalorder %s2103_s16, 0 }
  0x4d   : > { %220 = sbr.rel (%p1499_p8) target bundleno = 85 (0x55), region = 40 }
  0x52   : > { %v2060_v0 = vmov 0.0  }
  0x53   : > { %221 = vst [vmem:[#allocation2 + $0x10] sm:$0xff] %v2060_v0  ;;  %222 = vst [vmem:[#allocation2] sm:$0xff] %v2060_v0 }
  0x54   : > { %223 = vst [vmem:[#allocation2 + $0x18] sm:$0xff] %v2060_v0  ;;  %224 = vst [vmem:[#allocation2 + $0x8] sm:$0xff] %v2060_v0 }
  0x55 PF: > { %v1704_v1 = vld [vmem:[%s2218_s22 + $0xe4] ss:$16 sps:$4 sm:$0xff]   ;;  %v1708_v3 = vld [vmem:[%s2218_s22 + $0xe0] ss:$16 sps:$4 sm:$0xff]   ;;  %v230_v49 = vld [vmem:[%s2212_s29 + $0x8] sm:$0xff]  ;;  %p1632_p12 = scmp.ne.s32.totalorder %s2103_s16, 1 }
  0x56   : > { %v1706_v2 = vld [vmem:[%s2218_s22 + $0x2e4] ss:$16 sps:$4 sm:$0xff]   ;;  %1013 = vmatprep.subr.bf16.mxu0 %v1704_v1  ;;  %v1709_v4 = vld [vmem:[%s2218_s22 + $0x2e0] ss:$16 sps:$4 sm:$0xff]   ;;  %v1503_v52 = vcombine.high %v230_v49, %v230_v49 }
  0x57   : > { %1054 = vmatprep.subr.bf16.mxu1 %v1706_v2  ;;  %v1710_v5 = vld [vmem:[%s2218_s22 + $0xc4] ss:$16 sps:$4 sm:$0xff]   ;;  %1014 = vmatpush1.bf16.msra.mxu0 %v1708_v3  ;;  %v1714_v7 = vld [vmem:[%s2218_s22 + $0xc0] ss:$16 sps:$4 sm:$0xff]  }
  0x58   : > { %1055 = vmatpush1.bf16.msra.mxu1 %v1709_v4  ;;  %v1712_v6 = vld [vmem:[%s2218_s22 + $0x2c4] ss:$16 sps:$4 sm:$0xff]   ;;  %1015 = vmatprep.subr.bf16.mxu0 %v1710_v5  ;;  %v1715_v8 = vld [vmem:[%s2218_s22 + $0x2c0] ss:$16 sps:$4 sm:$0xff]   ;;  %v1806_v5 = vld [vmem:[%s2218_s22 + $0xec] ss:$16 sps:$4 sm:$0xff]  }
  0x59   : > { %1056 = vmatprep.subr.bf16.mxu1 %v1712_v6  ;;  %v1716_v9 = vld [vmem:[%s2218_s22 + $0xa4] ss:$16 sps:$4 sm:$0xff]   ;;  %v1720_v11 = vld [vmem:[%s2218_s22 + $0xa0] ss:$16 sps:$4 sm:$0xff]   ;;  %1086 = vmatprep.mubr.bf16.mxu1 %v1503_v52  ;;  %v1809_v6 = vld [vmem:[%s2218_s22 + $0x2ec] ss:$16 sps:$4 sm:$0xff]  }
  0x5a   : > { %v1718_v10 = vld [vmem:[%s2218_s22 + $0x2a4] ss:$16 sps:$4 sm:$0xff]   ;;  %v1721_v12 = vld [vmem:[%s2218_s22 + $0x2a0] ss:$16 sps:$4 sm:$0xff]  }
  0x5b   : > { %1016 = vmatpush1.bf16.msra.mxu0 %v1714_v7  ;;  %v1722_v13 = vld [vmem:[%s2218_s22 + $0x84] ss:$16 sps:$4 sm:$0xff]   ;;  %v1726_v15 = vld [vmem:[%s2218_s22 + $0x80] ss:$16 sps:$4 sm:$0xff]  }
  0x5c   : > { %1057 = vmatpush1.bf16.msra.mxu1 %v1715_v8  ;;  %1017 = vmatprep.subr.bf16.mxu0 %v1716_v9  ;;  %v1724_v14 = vld [vmem:[%s2218_s22 + $0x284] ss:$16 sps:$4 sm:$0xff]   ;;  %v1727_v16 = vld [vmem:[%s2218_s22 + $0x280] ss:$16 sps:$4 sm:$0xff]   ;;  %v2298_v8 = vcombine.low %v230_v49, %v230_v49  ;;  %v1804_v9 = vld [vmem:[%s2218_s22 + $0xe8] ss:$16 sps:$4 sm:$0xff]  }
  0x5d   : > { %1058 = vmatprep.subr.bf16.mxu1 %v1718_v10  ;;  %v1728_v17 = vld [vmem:[%s2218_s22 + $0x64] ss:$16 sps:$4 sm:$0xff]   ;;  %v1732_v19 = vld [vmem:[%s2218_s22 + $0x60] ss:$16 sps:$4 sm:$0xff]   ;;  %v1807_v10 = vld [vmem:[%s2218_s22 + $0x2e8] ss:$16 sps:$4 sm:$0xff]  }
  0x5e   : > { %v1730_v18 = vld [vmem:[%s2218_s22 + $0x264] ss:$16 sps:$4 sm:$0xff]   ;;  %v1733_v20 = vld [vmem:[%s2218_s22 + $0x260] ss:$16 sps:$4 sm:$0xff]   ;;  %v1864_v49 = vld [vmem:[%s2218_s22 + $0x1a8] ss:$16 sps:$4 sm:$0xff]  }
  0x5f   : > { %1018 = vmatpush1.bf16.msra.mxu0 %v1720_v11  ;;  %v1734_v21 = vld [vmem:[%s2218_s22 + $0x44] ss:$16 sps:$4 sm:$0xff]   ;;  %v1738_v23 = vld [vmem:[%s2218_s22 + $0x40] ss:$16 sps:$4 sm:$0xff]   ;;  %v1812_v11 = vld [vmem:[%s2218_s22 + $0xcc] ss:$16 sps:$4 sm:$0xff]  }
  0x60   : > { %1059 = vmatpush1.bf16.msra.mxu1 %v1721_v12  ;;  %1019 = vmatprep.subr.bf16.mxu0 %v1722_v13  ;;  %v1736_v22 = vld [vmem:[%s2218_s22 + $0x244] ss:$16 sps:$4 sm:$0xff]   ;;  %v1739_v24 = vld [vmem:[%s2218_s22 + $0x240] ss:$16 sps:$4 sm:$0xff]   ;;  %v1815_v12 = vld [vmem:[%s2218_s22 + $0x2cc] ss:$16 sps:$4 sm:$0xff]  }
  0x61   : > { %1060 = vmatprep.subr.bf16.mxu1 %v1724_v14  ;;  %v1740_v25 = vld [vmem:[%s2218_s22 + $0x24] ss:$16 sps:$4 sm:$0xff]   ;;  %v1744_v27 = vld [vmem:[%s2218_s22 + $0x20] ss:$16 sps:$4 sm:$0xff]   ;;  %v1810_v13 = vld [vmem:[%s2218_s22 + $0xc8] ss:$16 sps:$4 sm:$0xff]  }
  0x62   : > { %v1742_v26 = vld [vmem:[%s2218_s22 + $0x224] ss:$16 sps:$4 sm:$0xff]   ;;  %v1745_v28 = vld [vmem:[%s2218_s22 + $0x220] ss:$16 sps:$4 sm:$0xff]   ;;  %v1813_v14 = vld [vmem:[%s2218_s22 + $0x2c8] ss:$16 sps:$4 sm:$0xff]  }
  0x63   : > { %1020 = vmatpush1.bf16.msra.mxu0 %v1726_v15  ;;  %v1746_v29 = vld [vmem:[%s2218_s22 + $0x4] ss:$16 sps:$4 sm:$0xff]   ;;  %v1750_v31 = vld [vmem:[%s2218_s22] ss:$16 sps:$4 sm:$0xff]   ;;  %v1818_v15 = vld [vmem:[%s2218_s22 + $0xac] ss:$16 sps:$4 sm:$0xff]  }
  0x64   : > { %1061 = vmatpush1.bf16.msra.mxu1 %v1727_v16  ;;  %1021 = vmatprep.subr.bf16.mxu0 %v1728_v17  ;;  %v1748_v30 = vld [vmem:[%s2218_s22 + $0x204] ss:$16 sps:$4 sm:$0xff]   ;;  %v1751_v32 = vld [vmem:[%s2218_s22 + $0x200] ss:$16 sps:$4 sm:$0xff]   ;;  %v1821_v16 = vld [vmem:[%s2218_s22 + $0x2ac] ss:$16 sps:$4 sm:$0xff]  }
  0x65   : > { %1062 = vmatprep.subr.bf16.mxu1 %v1730_v18  ;;  %v1752_v33 = vld [vmem:[%s2218_s22 + $0x1e4] ss:$16 sps:$4 sm:$0xff]   ;;  %v1756_v35 = vld [vmem:[%s2218_s22 + $0x1e0] ss:$16 sps:$4 sm:$0xff]   ;;  %v1816_v17 = vld [vmem:[%s2218_s22 + $0xa8] ss:$16 sps:$4 sm:$0xff]  }
  0x66   : > { %v1754_v34 = vld [vmem:[%s2218_s22 + $0x3e4] ss:$16 sps:$4 sm:$0xff]   ;;  %v1757_v36 = vld [vmem:[%s2218_s22 + $0x3e0] ss:$16 sps:$4 sm:$0xff]   ;;  %v1819_v18 = vld [vmem:[%s2218_s22 + $0x2a8] ss:$16 sps:$4 sm:$0xff]  }
  0x67   : > { %1022 = vmatpush1.bf16.msra.mxu0 %v1732_v19  ;;  %v1758_v37 = vld [vmem:[%s2218_s22 + $0x1c4] ss:$16 sps:$4 sm:$0xff]   ;;  %v1762_v39 = vld [vmem:[%s2218_s22 + $0x1c0] ss:$16 sps:$4 sm:$0xff]   ;;  %v1824_v19 = vld [vmem:[%s2218_s22 + $0x8c] ss:$16 sps:$4 sm:$0xff]  }
  0x68   : > { %1063 = vmatpush1.bf16.msra.mxu1 %v1733_v20  ;;  %1023 = vmatprep.subr.bf16.mxu0 %v1734_v21  ;;  %v1760_v38 = vld [vmem:[%s2218_s22 + $0x3c4] ss:$16 sps:$4 sm:$0xff]   ;;  %v1763_v40 = vld [vmem:[%s2218_s22 + $0x3c0] ss:$16 sps:$4 sm:$0xff]   ;;  %v1827_v20 = vld [vmem:[%s2218_s22 + $0x28c] ss:$16 sps:$4 sm:$0xff]  }
  0x69   : > { %1064 = vmatprep.subr.bf16.mxu1 %v1736_v22  ;;  %v1764_v41 = vld [vmem:[%s2218_s22 + $0x1a4] ss:$16 sps:$4 sm:$0xff]   ;;  %v1768_v43 = vld [vmem:[%s2218_s22 + $0x1a0] ss:$16 sps:$4 sm:$0xff]   ;;  %v1822_v21 = vld [vmem:[%s2218_s22 + $0x88] ss:$16 sps:$4 sm:$0xff]  }
  0x6a   : > { %v1766_v42 = vld [vmem:[%s2218_s22 + $0x3a4] ss:$16 sps:$4 sm:$0xff]   ;;  %v1769_v44 = vld [vmem:[%s2218_s22 + $0x3a0] ss:$16 sps:$4 sm:$0xff]   ;;  %v1825_v22 = vld [vmem:[%s2218_s22 + $0x288] ss:$16 sps:$4 sm:$0xff]  }
  0x6b   : > { %1024 = vmatpush1.bf16.msra.mxu0 %v1738_v23  ;;  %v1770_v45 = vld [vmem:[%s2218_s22 + $0x184] ss:$16 sps:$4 sm:$0xff]   ;;  %v1774_v50 = vld [vmem:[%s2218_s22 + $0x180] ss:$16 sps:$4 sm:$0xff]   ;;  %v1830_v23 = vld [vmem:[%s2218_s22 + $0x6c] ss:$16 sps:$4 sm:$0xff]  }
  0x6c   : > { %1065 = vmatpush1.bf16.msra.mxu1 %v1739_v24  ;;  %1025 = vmatprep.subr.bf16.mxu0 %v1740_v25  ;;  %v1772_v46 = vld [vmem:[%s2218_s22 + $0x384] ss:$16 sps:$4 sm:$0xff]   ;;  %v1775_v51 = vld [vmem:[%s2218_s22 + $0x380] ss:$16 sps:$4 sm:$0xff]   ;;  %v1833_v24 = vld [vmem:[%s2218_s22 + $0x26c] ss:$16 sps:$4 sm:$0xff]  }
  0x6d   : > { %1066 = vmatprep.subr.bf16.mxu1 %v1742_v26  ;;  %v229_v47 = vld [vmem:[%s2212_s29] sm:$0xff]  ;;  %v1828_v25 = vld [vmem:[%s2218_s22 + $0x68] ss:$16 sps:$4 sm:$0xff]  }
  0x6e   : > { %v2272_v48 = vcombine.high %v229_v47, %v229_v47  ;;  %v1776_v53 = vld [vmem:[%s2218_s22 + $0x164] ss:$16 sps:$4 sm:$0xff]   ;;  %v1780_v55 = vld [vmem:[%s2218_s22 + $0x160] ss:$16 sps:$4 sm:$0xff]   ;;  %v2296_v7 = vcombine.low %v229_v47, %v229_v47  ;;  %v1831_v26 = vld [vmem:[%s2218_s22 + $0x268] ss:$16 sps:$4 sm:$0xff]  }
  0x6f   : > { %1026 = vmatpush1.bf16.msra.mxu0 %v1744_v27  ;;  %v1778_v54 = vld [vmem:[%s2218_s22 + $0x364] ss:$16 sps:$4 sm:$0xff]   ;;  %v1781_v56 = vld [vmem:[%s2218_s22 + $0x360] ss:$16 sps:$4 sm:$0xff]   ;;  %v1836_v27 = vld [vmem:[%s2218_s22 + $0x4c] ss:$16 sps:$4 sm:$0xff]  }
  0x70   : > { %1067 = vmatpush1.bf16.msra.mxu1 %v1745_v28  ;;  %1027 = vmatprep.subr.bf16.mxu0 %v1746_v29  ;;  %v1782_v57 = vld [vmem:[%s2218_s22 + $0x144] ss:$16 sps:$4 sm:$0xff]   ;;  %v1786_v59 = vld [vmem:[%s2218_s22 + $0x140] ss:$16 sps:$4 sm:$0xff]   ;;  %v1839_v28 = vld [vmem:[%s2218_s22 + $0x24c] ss:$16 sps:$4 sm:$0xff]  }
  0x71   : > { %1068 = vmatprep.subr.bf16.mxu1 %v1748_v30  ;;  %1045 = vmatprep.mubr.bf16.mxu0 %v2272_v48  ;;  %v1784_v58 = vld [vmem:[%s2218_s22 + $0x344] ss:$16 sps:$4 sm:$0xff]   ;;  %v1787_v60 = vld [vmem:[%s2218_s22 + $0x340] ss:$16 sps:$4 sm:$0xff]   ;;  %v1834_v29 = vld [vmem:[%s2218_s22 + $0x48] ss:$16 sps:$4 sm:$0xff]  }
  0x72   : > { %v1788_v61 = vld [vmem:[%s2218_s22 + $0x124] ss:$16 sps:$4 sm:$0xff]   ;;  %v1792_v63 = vld [vmem:[%s2218_s22 + $0x120] ss:$16 sps:$4 sm:$0xff]   ;;  %v1837_v30 = vld [vmem:[%s2218_s22 + $0x248] ss:$16 sps:$4 sm:$0xff]  }
  0x73   : > { %1028 = vmatpush1.bf16.msra.mxu0 %v1750_v31  ;;  %v1790_v62 = vld [vmem:[%s2218_s22 + $0x324] ss:$16 sps:$4 sm:$0xff]   ;;  %v1793_v0 = vld [vmem:[%s2218_s22 + $0x320] ss:$16 sps:$4 sm:$0xff]   ;;  %v1842_v31 = vld [vmem:[%s2218_s22 + $0x2c] ss:$16 sps:$4 sm:$0xff]  }
  0x74   : > { %1069 = vmatpush1.bf16.msra.mxu1 %v1751_v32  ;;  %1029 = vmatprep.subr.bf16.mxu0 %v1752_v33  ;;  %v1794_v1 = vld [vmem:[%s2218_s22 + $0x104] ss:$16 sps:$4 sm:$0xff]   ;;  %v1798_v3 = vld [vmem:[%s2218_s22 + $0x100] ss:$16 sps:$4 sm:$0xff]   ;;  %v1845_v32 = vld [vmem:[%s2218_s22 + $0x22c] ss:$16 sps:$4 sm:$0xff]  }
  0x75   : > { %1070 = vmatprep.subr.bf16.mxu1 %v1754_v34  ;;  %v1796_v2 = vld [vmem:[%s2218_s22 + $0x304] ss:$16 sps:$4 sm:$0xff]   ;;  %v1799_v4 = vld [vmem:[%s2218_s22 + $0x300] ss:$16 sps:$4 sm:$0xff]   ;;  %v1840_v33 = vld [vmem:[%s2218_s22 + $0x28] ss:$16 sps:$4 sm:$0xff]  }
  0x76   : > { %v1843_v34 = vld [vmem:[%s2218_s22 + $0x228] ss:$16 sps:$4 sm:$0xff]   ;;  %v1866_v47 = vld [vmem:[%s2218_s22 + $0x1ac] ss:$16 sps:$4 sm:$0xff]  }
  0x77   : > { %1030 = vmatpush2.bf16.msra.mxu0 %v1756_v35  ;;  %v1848_v35 = vld [vmem:[%s2218_s22 + $0xc] ss:$16 sps:$4 sm:$0xff]  }
  0x78   : > { %1071 = vmatpush2.bf16.msra.mxu1 %v1757_v36  ;;  %1031 = vmatprep.subr.bf16.mxu0 %v1758_v37  ;;  %v1851_v36 = vld [vmem:[%s2218_s22 + $0x20c] ss:$16 sps:$4 sm:$0xff]   ;;  %v1846_v37 = vld [vmem:[%s2218_s22 + $0x8] ss:$16 sps:$4 sm:$0xff]  }
  0x79   : > { %1072 = vmatprep.subr.bf16.mxu1 %v1760_v38  ;;  %v1849_v38 = vld [vmem:[%s2218_s22 + $0x208] ss:$16 sps:$4 sm:$0xff]  }
  0x7b   : > { %1032 = vmatpush2.bf16.msra.mxu0 %v1762_v39  ;;  %v1854_v39 = vld [vmem:[%s2218_s22 + $0x1ec] ss:$16 sps:$4 sm:$0xff]  }
  0x7c   : > { %1073 = vmatpush2.bf16.msra.mxu1 %v1763_v40  ;;  %1033 = vmatprep.subr.bf16.mxu0 %v1764_v41  ;;  %v1857_v40 = vld [vmem:[%s2218_s22 + $0x3ec] ss:$16 sps:$4 sm:$0xff]   ;;  %v1852_v41 = vld [vmem:[%s2218_s22 + $0x1e8] ss:$16 sps:$4 sm:$0xff]  }
  0x7d   : > { %1074 = vmatprep.subr.bf16.mxu1 %v1766_v42  ;;  %v1855_v42 = vld [vmem:[%s2218_s22 + $0x3e8] ss:$16 sps:$4 sm:$0xff]  }
  0x7f   : > { %1034 = vmatpush2.bf16.msra.mxu0 %v1768_v43  ;;  %v1860_v43 = vld [vmem:[%s2218_s22 + $0x1cc] ss:$16 sps:$4 sm:$0xff]  }
  0x80   : > { %1075 = vmatpush2.bf16.msra.mxu1 %v1769_v44  ;;  %1035 = vmatprep.subr.bf16.mxu0 %v1770_v45  ;;  %v1863_v44 = vld [vmem:[%s2218_s22 + $0x3cc] ss:$16 sps:$4 sm:$0xff]   ;;  %v1858_v45 = vld [vmem:[%s2218_s22 + $0x1c8] ss:$16 sps:$4 sm:$0xff]  }
  0x81   : > { %1076 = vmatprep.subr.bf16.mxu1 %v1772_v46  ;;  %v1861_v46 = vld [vmem:[%s2218_s22 + $0x3c8] ss:$16 sps:$4 sm:$0xff]  }
  0x83   : > { %1036 = vmatpush2.bf16.msra.mxu0 %v1774_v50  ;;  %v1867_v50 = vld [vmem:[%s2218_s22 + $0x3a8] ss:$16 sps:$4 sm:$0xff]  }
  0x84   : > { %1077 = vmatpush2.bf16.msra.mxu1 %v1775_v51  ;;  %1037 = vmatprep.subr.bf16.mxu0 %v1776_v53  ;;  %v1872_v51 = vld [vmem:[%s2218_s22 + $0x18c] ss:$16 sps:$4 sm:$0xff]   ;;  %v1870_v53 = vld [vmem:[%s2218_s22 + $0x188] ss:$16 sps:$4 sm:$0xff]  }
  0x85   : > { %1078 = vmatprep.subr.bf16.mxu1 %v1778_v54  ;;  %v1873_v54 = vld [vmem:[%s2218_s22 + $0x388] ss:$16 sps:$4 sm:$0xff]  }
  0x87   : > { %1038 = vmatpush2.bf16.msra.mxu0 %v1780_v55  ;;  %v1878_v55 = vld [vmem:[%s2218_s22 + $0x16c] ss:$16 sps:$4 sm:$0xff]  }
  0x88   : > { %1079 = vmatpush2.bf16.msra.mxu1 %v1781_v56  ;;  %1039 = vmatprep.subr.bf16.mxu0 %v1782_v57  ;;  %v1881_v56 = vld [vmem:[%s2218_s22 + $0x36c] ss:$16 sps:$4 sm:$0xff]   ;;  %v1876_v57 = vld [vmem:[%s2218_s22 + $0x168] ss:$16 sps:$4 sm:$0xff]  }
  0x89   : > { %1080 = vmatprep.subr.bf16.mxu1 %v1784_v58  ;;  %v1879_v58 = vld [vmem:[%s2218_s22 + $0x368] ss:$16 sps:$4 sm:$0xff]  }
  0x8b   : > { %1040 = vmatpush2.bf16.msra.mxu0 %v1786_v59  ;;  %v1884_v59 = vld [vmem:[%s2218_s22 + $0x14c] ss:$16 sps:$4 sm:$0xff]  }
  0x8c   : > { %1081 = vmatpush2.bf16.msra.mxu1 %v1787_v60  ;;  %1041 = vmatprep.subr.bf16.mxu0 %v1788_v61  ;;  %v1887_v60 = vld [vmem:[%s2218_s22 + $0x34c] ss:$16 sps:$4 sm:$0xff]   ;;  %v1882_v61 = vld [vmem:[%s2218_s22 + $0x148] ss:$16 sps:$4 sm:$0xff]  }
  0x8d   : > { %1082 = vmatprep.subr.bf16.mxu1 %v1790_v62  ;;  %v1885_v62 = vld [vmem:[%s2218_s22 + $0x348] ss:$16 sps:$4 sm:$0xff]  }
  0x8f   : > { %1042 = vmatpush2.bf16.msra.mxu0 %v1792_v63  ;;  %v1890_v63 = vld [vmem:[%s2218_s22 + $0x12c] ss:$16 sps:$4 sm:$0xff]  }
  0x90   : > { %1083 = vmatpush2.bf16.msra.mxu1 %v1793_v0  ;;  %1043 = vmatprep.subr.bf16.mxu0 %v1794_v1  ;;  %v1893_v0 = vld [vmem:[%s2218_s22 + $0x32c] ss:$16 sps:$4 sm:$0xff]   ;;  %v1888_v1 = vld [vmem:[%s2218_s22 + $0x128] ss:$16 sps:$4 sm:$0xff]  }
  0x91   : > { %1084 = vmatprep.subr.bf16.mxu1 %v1796_v2  ;;  %v1891_v2 = vld [vmem:[%s2218_s22 + $0x328] ss:$16 sps:$4 sm:$0xff]  }
  0x93   : > { %1044 = vmatpush2.bf16.msra.mxu0 %v1798_v3  ;;  %v1896_v3 = vld [vmem:[%s2218_s22 + $0x10c] ss:$16 sps:$4 sm:$0xff]  }
  0x94   : > { %1085 = vmatpush2.bf16.msra.mxu1 %v1799_v4  ;;  %1095 = vmatprep.subr.bf16.mxu0 %v1806_v5  ;;  %v1899_v4 = vld [vmem:[%s2218_s22 + $0x30c] ss:$16 sps:$4 sm:$0xff]   ;;  %v1894_v5 = vld [vmem:[%s2218_s22 + $0x108] ss:$16 sps:$4 sm:$0xff]  }
  0x95   : > { %1136 = vmatprep.subr.bf16.mxu1 %v1809_v6  ;;  %v1897_v6 = vld [vmem:[%s2218_s22 + $0x308] ss:$16 sps:$4 sm:$0xff]  }
  0x96   : > { %1046 = vmatmul.mubr.bf16.vlgmr.msra.gmra.mxu0 %v2296_v7 }
  0x97   : > { %1087 = vmatmul.mubr.bf16.vlgmr.msra.gmra.mxu1 %v2298_v8  ;;  %1096 = vmatpush1.bf16.msra.mxu0 %v1804_v9 }
  0x98   : > { %1137 = vmatpush1.bf16.msra.mxu1 %v1807_v10  ;;  %1097 = vmatprep.subr.bf16.mxu0 %v1812_v11  ;;  %v225_v10 = vld [vmem:[#allocation2 + $0x10] sm:$0xff] }
  0x99   : > { %1138 = vmatprep.subr.bf16.mxu1 %v1815_v12  ;;  %1127 = vmatprep.mubr.bf16.mxu0 %v2272_v48  ;;  %v1869_v48 = vld [vmem:[%s2218_s22 + $0x3ac] ss:$16 sps:$4 sm:$0xff]  }
  0x9a   : > { %1168 = vmatprep.mubr.bf16.mxu1 %v1503_v52  ;;  %v1875_v52 = vld [vmem:[%s2218_s22 + $0x38c] ss:$16 sps:$4 sm:$0xff]  }
  0x9b   : > { %1098 = vmatpush1.bf16.msra.mxu0 %v1810_v13 }
  0x9c   : > { %1139 = vmatpush1.bf16.msra.mxu1 %v1813_v14  ;;  %1099 = vmatprep.subr.bf16.mxu0 %v1818_v15  ;;  %v226_v14 = vld [vmem:[#allocation2] sm:$0xff] }
  0x9d   : > { %1140 = vmatprep.subr.bf16.mxu1 %v1821_v16 }
  0x9f   : > { %1100 = vmatpush1.bf16.msra.mxu0 %v1816_v17 }
  0xa0   : > { %1141 = vmatpush1.bf16.msra.mxu1 %v1819_v18  ;;  %1101 = vmatprep.subr.bf16.mxu0 %v1824_v19 }
  0xa1   : > { %1142 = vmatprep.subr.bf16.mxu1 %v1827_v20 }
  0xa3   : > { %1102 = vmatpush1.bf16.msra.mxu0 %v1822_v21 }
  0xa4   : > { %1143 = vmatpush1.bf16.msra.mxu1 %v1825_v22  ;;  %1103 = vmatprep.subr.bf16.mxu0 %v1830_v23 }
  0xa5   : > { %1144 = vmatprep.subr.bf16.mxu1 %v1833_v24 }
  0xa7   : > { %1104 = vmatpush1.bf16.msra.mxu0 %v1828_v25 }
  0xa8   : > { %1145 = vmatpush1.bf16.msra.mxu1 %v1831_v26  ;;  %1105 = vmatprep.subr.bf16.mxu0 %v1836_v27  ;;  %v228_v26 = vld [vmem:[#allocation2 + $0x8] sm:$0xff] }
  0xa9   : > { %1146 = vmatprep.subr.bf16.mxu1 %v1839_v28 }
  0xab   : > { %1106 = vmatpush1.bf16.msra.mxu0 %v1834_v29 }
  0xac   : > { %1147 = vmatpush1.bf16.msra.mxu1 %v1837_v30  ;;  %1107 = vmatprep.subr.bf16.mxu0 %v1842_v31 }
  0xad   : > { %1148 = vmatprep.subr.bf16.mxu1 %v1845_v32 }
  0xaf   : > { %1108 = vmatpush1.bf16.msra.mxu0 %v1840_v33 }
  0xb0   : > { %1149 = vmatpush1.bf16.msra.mxu1 %v1843_v34  ;;  %1109 = vmatprep.subr.bf16.mxu0 %v1848_v35 }
  0xb1   : > { %1150 = vmatprep.subr.bf16.mxu1 %v1851_v36 }
  0xb3   : > { %1110 = vmatpush1.bf16.msra.mxu0 %v1846_v37 }
  0xb4   : > { %1151 = vmatpush1.bf16.msra.mxu1 %v1849_v38  ;;  %1111 = vmatprep.subr.bf16.mxu0 %v1854_v39 }
  0xb5   : > { %1152 = vmatprep.subr.bf16.mxu1 %v1857_v40 }
  0xb7   : > { %1112 = vmatpush2.bf16.msra.mxu0 %v1852_v41 }
  0xb8   : > { %1153 = vmatpush2.bf16.msra.mxu1 %v1855_v42  ;;  %1113 = vmatprep.subr.bf16.mxu0 %v1860_v43 }
  0xb9   : > { %1154 = vmatprep.subr.bf16.mxu1 %v1863_v44 }
  0xbb   : > { %1114 = vmatpush2.bf16.msra.mxu0 %v1858_v45 }
  0xbc   : > { %1155 = vmatpush2.bf16.msra.mxu1 %v1861_v46  ;;  %1115 = vmatprep.subr.bf16.mxu0 %v1866_v47 }
  0xbd   : > { %1156 = vmatprep.subr.bf16.mxu1 %v1869_v48 }
  0xbf   : > { %1116 = vmatpush2.bf16.msra.mxu0 %v1864_v49 }
  0xc0   : > { %1157 = vmatpush2.bf16.msra.mxu1 %v1867_v50  ;;  %1117 = vmatprep.subr.bf16.mxu0 %v1872_v51 }
  0xc1   : > { %1158 = vmatprep.subr.bf16.mxu1 %v1875_v52 }
  0xc3   : > { %1118 = vmatpush2.bf16.msra.mxu0 %v1870_v53 }
  0xc4   : > { %1159 = vmatpush2.bf16.msra.mxu1 %v1873_v54  ;;  %1119 = vmatprep.subr.bf16.mxu0 %v1878_v55 }
  0xc5   : > { %1160 = vmatprep.subr.bf16.mxu1 %v1881_v56 }
  0xc7   : > { %1120 = vmatpush2.bf16.msra.mxu0 %v1876_v57 }
  0xc8   : > { %1161 = vmatpush2.bf16.msra.mxu1 %v1879_v58  ;;  %1121 = vmatprep.subr.bf16.mxu0 %v1884_v59 }
  0xc9   : > { %1162 = vmatprep.subr.bf16.mxu1 %v1887_v60 }
  0xcb   : > { %1122 = vmatpush2.bf16.msra.mxu0 %v1882_v61 }
  0xcc   : > { %1163 = vmatpush2.bf16.msra.mxu1 %v1885_v62  ;;  %1123 = vmatprep.subr.bf16.mxu0 %v1890_v63 }
  0xcd   : > { %1164 = vmatprep.subr.bf16.mxu1 %v1893_v0 }
  0xcf   : > { %1124 = vmatpush2.bf16.msra.mxu0 %v1888_v1 }
  0xd0   : > { %1165 = vmatpush2.bf16.msra.mxu1 %v1891_v2  ;;  %1125 = vmatprep.subr.bf16.mxu0 %v1896_v3 }
  0xd1   : > { %1166 = vmatprep.subr.bf16.mxu1 %v1899_v4 }
  0xd3   : > { %1126 = vmatpush2.bf16.msra.mxu0 %v1894_v5 }
  0xd4   : > { %1167 = vmatpush2.bf16.msra.mxu1 %v1897_v6 }
  0xd6   : > { %1128 = vmatmul.mubr.bf16.vlgmr.msra.gmra.mxu0 %v2296_v7  ;;  %v227_v7 = vld [vmem:[#allocation2 + $0x18] sm:$0xff] }
  0xd7   : > { %1169 = vmatmul.mubr.bf16.vlgmr.msra.gmra.mxu1 %v2298_v8 }
 0x156   : > { %v1047_v9 = vpop.f32.mrf.mxu0 }
 0x157   : > { %v1088_v11 = vpop.f32.mrf.mxu1 }
 0x158   : > { %v1089_v12 = vadd.f32 %v1088_v11, %v1047_v9  ;;  %v1049_v13 = vpop.f32.mrf.mxu0 }
 0x159   : > { %v1090_v15 = vpop.f32.mrf.mxu1 }
 0x15a   : > { %v1177_v16 = vadd.f32 %v1089_v12, %v225_v10  ;;  %v1091_v17 = vadd.f32 %v1090_v15, %v1049_v13  ;;  %v1051_v18 = vpop.f32.mrf.mxu0 }
 0x15b   : > { %v1092_v19 = vpop.f32.mrf.mxu1 }
 0x15c   : > { %1181 = vst [vmem:[#allocation2 + $0x10] sm:$0xff] %v1177_v16  ;;  %v1178_v20 = vadd.f32 %v1091_v17, %v226_v14  ;;  %v1052_v21 = vpop.f32.mrf.mxu0 }
 0x15d   : > { %v1093_v22 = vpop.f32.mrf.mxu1 }
 0x15e   : > { %1182 = vst [vmem:[#allocation2] sm:$0xff] %v1178_v20 }
 0x196   : > { %v1129_v23 = vpop.f32.mrf.mxu0 }
 0x197   : > { %v1170_v24 = vpop.f32.mrf.mxu1 }
 0x198   : > { %v1171_v8 = vadd.f32 %v1170_v24, %v1129_v23  ;;  %v1131_v25 = vpop.f32.mrf.mxu0 }
 0x199   : > { %v1172_v27 = vpop.f32.mrf.mxu1 }
 0x19a   : > { %v1179_v28 = vadd.f32 %v1171_v8, %v227_v7  ;;  %v1173_v29 = vadd.f32 %v1172_v27, %v1131_v25  ;;  %v1133_v30 = vpop.f32.mrf.mxu0  ;;  %1188 = sbr.rel (%p1632_p12) target bundleno = 1087 (0x43f), region = 44 }
 0x19b   : > { %v1174_v31 = vpop.f32.mrf.mxu1 }
 0x19c   : > { %1183 = vst [vmem:[#allocation2 + $0x18] sm:$0xff] %v1179_v28  ;;  %v1180_v32 = vadd.f32 %v1173_v29, %v228_v26  ;;  %v1134_v33 = vpop.f32.mrf.mxu0 }
 0x19d   : > { %v1175_v34 = vpop.f32.mrf.mxu1 }
 0x19e   : > { %1184 = vst [vmem:[#allocation2 + $0x8] sm:$0xff] %v1180_v32 }
 0x19f   : > { %v1189_v35 = vld [vmem:[#allocation2 + $0x10] sm:$0xff]  ;;  %v1190_v36 = vld [vmem:[#allocation2] sm:$0xff]  ;;  %v1353_v53 = vlaneseq  ;;  %vm1359_vm2 = vcmask 64512   ;;  %v2061_v12 = vmov 0.0  }
 0x1a0   : > { %v1193_v39 = vmul.f32 %v1189_v35, %v1189_v35  ;;  %v1194_v40 = vmul.f32 %v1190_v36, %v1190_v36 }
 0x1a1   : > { %v1354_v54 = vshrl.u32 %v1353_v53, 7  ;;  %v1356_v55 = vand.u32 127, %v1353_v53 }
 0x1a2   : > { %v1197_v43 = vadd.f32 %v1194_v40, %v1193_v39 }
 0x1a3   : > { %v1191_v37 = vld [vmem:[#allocation2 + $0x18] sm:$0xff]  ;;  %vm1357_vm1 = vcmp.eq.s32.totalorder %v1354_v54, %v1356_v55 }
 0x1a4   : > { %v1195_v41 = vmul.f32 %v1191_v37, %v1191_v37  ;;  %v1374_v13 = vsel %vm1357_vm1, 1.0, %v2061_v12 }
 0x1a5   : > { %v1192_v38 = vld [vmem:[#allocation2 + $0x8] sm:$0xff] }
 0x1a6   : > { %v1196_v42 = vmul.f32 %v1192_v38, %v1192_v38  ;;  %v1198_v44 = vadd.f32 %v1197_v43, %v1195_v41 }
 0x1a8   : > { %v1199_v45 = vadd.f32 %v1198_v44, %v1196_v42 }
 0x1aa   : > { %1200 = vadd.xlane.f32.xlu0 %v1199_v45 }
 0x233   : > { %v1201_v46 = vpop.xlane.xlu0 %1200 }
 0x234   : > { %1900 = vrcp.f32 %v1201_v46  ;;  %vm1202_vm0 = vcmp.eq.f32.partialorder %v1201_v46, 0.0 }
 0x241   : > { %v1901_v47 = vpop.eup %1900 }
 0x242   : > { %v1204_v48 = vsel %vm1202_vm0, 0.0, %v1901_v47 }
 0x243   : > { %v1206_v49 = vmul.f32 %v1204_v48, %v1194_v40  ;;  %v1208_v50 = vmul.f32 %v1204_v48, %v1196_v42  ;;  %v1205_v51 = vmul.f32 %v1204_v48, %v1193_v39  ;;  %v1207_v52 = vmul.f32 %v1204_v48, %v1195_v41 }
 0x245   : > { %1210 = vst [vmem:[#allocation8 + $0x8] sm:$0xff] %v1206_v49  ;;  %1243 = vmatprep.subr.mxu0 %v1206_v49  ;;  %1277 = vmatprep.mubr.f32.mxu0 %v1206_v49  ;;  %1212 = vst [vmem:[#allocation8 + $0x18] sm:$0xff] %v1208_v50 }
 0x246   : > { %1209 = vst [vmem:[#allocation8] sm:$0xff] %v1205_v51  ;;  %1211 = vst [vmem:[#allocation8 + $0x10] sm:$0xff] %v1207_v52  ;;  %1313 = vmatprep.subr.mxu1 %v1208_v50  ;;  %1347 = vmatprep.mubr.f32.mxu1 %v1208_v50 }
 0x247   : > { %1244 = vmatpush1.xpose.msra.mxu0 %v1205_v51  ;;  %1314 = vmatpush1.xpose.msra.mxu1 %v1207_v52 }
 0x24a   : > { %1278 = vmatmul.mubr.f32.vlgmr.msra.gmra.mxu0 %v1205_v51  ;;  %1348 = vmatmul.mubr.f32.vlgmr.msra.gmra.mxu1 %v1207_v52 }
 0x30a   : > { %v1279_v56 = vpop.f32.mrf.mxu0  ;;  %v1349_v57 = vpop.f32.mrf.mxu1 }
 0x30b   : > { %v1350_v58 = vadd.f32 %v1349_v57, %v1279_v56 }
 0x30c   : > { %v1281_v59 = vpop.f32.mrf.mxu0  ;;  %v1351_v60 = vpop.f32.mrf.mxu1 }
 0x30d   : > { %v1358_v61 = vsel %vm1357_vm1, %v1350_v58, 0.0  ;;  %v1370_v6 = vmul.f32 2.0, %v1350_v58 }
 0x30e   : > { %v1360_v62 = vsel %vm1359_vm2, %v1358_v61, 0.0 }
 0x30f   : > { %1361 = vadd.xlane.f32.xlu0 %v1360_v62  ;;  %v1363_v63 = vrot.slane %v1360_v62, 4 }
 0x311   : > { %v1364_v0 = vadd.f32 %v1363_v63, %v1360_v62 }
 0x313   : > { %v1365_v1 = vrot.slane %v1364_v0, 2 }
 0x315   : > { %v1366_v2 = vadd.f32 %v1365_v1, %v1364_v0 }
 0x317   : > { %v1367_v3 = vrot.slane %v1366_v2, 1 }
 0x319   : > { %v1368_v4 = vadd.f32 %v1367_v3, %v1366_v2 }
 0x398   : > { %v1362_v5 = vpop.xlane.xlu0 %1361 }
 0x399   : > { %v1369_v9 = vadd.f32 %v1368_v4, %v1362_v5 }
 0x39b   : > { %v1371_v10 = vsub.f32 %v1369_v9, %v1370_v6 }
 0x39d   : > { %v1372_v11 = vmax.f32 %v1371_v10, 0.0 }
 0x39f   : > { %v1373_v14 = vsel %vm1357_vm1, 0.0, %v1372_v11 }
 0x3a0   : > { %v1375_v15 = vadd.f32 %v1374_v13, %v1373_v14 }
 0x3a2   : > { %v1376_v16 = vsel %vm1359_vm2, %v1375_v15, 0.0 }
 0x3a3   : > { %1377 = vadd.xlane.f32.xlu1 %v1376_v16 }
 0x42c   : > { %v1378_v17 = vpop.xlane.xlu1 %1377 }
 0x42d   : > { %1902 = vrcp.f32 %v1378_v17  ;;  %vm1379_vm3 = vcmp.eq.f32.partialorder %v1378_v17, 0.0 }
 0x43a   : > { %v1903_v18 = vpop.eup %1902 }
 0x43b   : > { %v1381_v19 = vsel %vm1379_vm3, 0.0, %v1903_v18 }
 0x43c   : > { %v1382_v20 = vmul.f32 %v1381_v19, %v1375_v15 }
 0x43e   : > { %1383 = vst.msk [vmem:[#allocation9] sm:$0xff] %vm1359_vm2, %v1382_v20 }
 0x43f PF: > { %p1662_p3 = scmp.eq.s32.totalorder %s2103_s16, 1  ;;  %s2062_s21 = smov [#allocation8]  }
 0x440   : > { %s1391_s23 = sshll.u32 %s2062_s21, 4  ;;  %s2063_s5 = smov [#allocation9]   ;;  %s1392_s23 = int_to_ptr.vmem [resolvable:$true] %s1391_s23 }
 0x441   : > { %s1402_s7 = sshll.u32 %s2063_s5, 4  ;;  %s1960_s27 = scalar_lea.vmem %s1392_s23, 512  ;;  %s1403_s7 = int_to_ptr.vmem [resolvable:$true] %s1402_s7 }
 0x442   : > { %p1961_p4 = scmp.ne.s32.totalorder %s1392_s23, %s1960_s27  ;;  %p1967_p13 = scmp.lt.s32.totalorder %s1392_s23, %s1392_s23 }
 0x443   : > { %p1968_p1 = scmp.lt.s32.totalorder %s1960_s27, %s1960_s27 }
 0x444   : > { %p1962_p6 = pnand %p1961_p4, %p1662_p3 }
 0x445   : > { %p1969_p0 = por %p1968_p1, %p1967_p13 }
 0x446   : > { %p1963_p11 = pneg %p1962_p6 }
 0x448   : > { %p1970_p2 = pnand %p1969_p0, %p1963_p11 }
 0x44a   : > { %1973 = shalt.err (!%p1970_p2)
}
 0x44b   : > { %1647 = dma.vmem_to_hbm [thread:$0]  (%p1662_p3), %s1392_s23, 512, %s2412_s2, [#allocation5]  }
 0x44c   : > { %s1984_s9 = scalar_lea.vmem %s1403_s7, 128  ;;  %p1991_p7 = scmp.lt.s32.totalorder %s1403_s7, %s1403_s7 }
 0x44d   : > { %p1985_p9 = scmp.ne.s32.totalorder %s1403_s7, %s1984_s9  ;;  %p1992_p8 = scmp.lt.s32.totalorder %s1984_s9, %s1984_s9 }
 0x44f   : > { %p1986_p10 = pnand %p1985_p9, %p1662_p3  ;;  %p1993_p12 = por %p1992_p8, %p1991_p7 }
 0x451   : > { %p1987_p5 = pneg %p1986_p10 }
 0x453   : > { %p1994_p4 = pnand %p1993_p12, %p1987_p5 }
 0x455   : > { %1997 = shalt.err (!%p1994_p4)
}
 0x456   : > { %1649 = dma.vmem_to_hbm [thread:$0]  (%p1662_p3), %s1403_s7, 128, %s2413_s3, [#allocation10]  }
 0x457   : > { %2033 = dma.done.wait (%p1662_p3), [#allocation5], 512  }
 0x458   : > { %2035 = vsyncadd (%p1662_p3), [#allocation5], 4294966784 }
 0x459   : > { %2037 = dma.done.wait (%p1662_p3), [#allocation10], 128  }
 0x45a   : > { %2039 = vsyncadd (%p1662_p3), [#allocation10], 4294967168 }
 0x45b PF: > { %p19_p6 = scmp.ge.s32.totalorder %s2106_s17, 4   ;;  %s2421_s12 = smov %s2046_s13 }
 0x45c   : > { %s2422_s13 = smov %s2050_s14  ;;  %s2423_s14 = smov %s2116_s20 }
 0x45d   : > { %s2424_s15 = smov %s2106_s17  ;;  %21 = sbr.rel (!%p19_p6) target bundleno = 7 (0x7), region = 94 }
 0x462   :  { %1419 = vsyncpa [#allocation4], 1 }
 0x463   :  { %1421 = vsyncpa [#allocation4 + $0x1], 1 }
 0x464   :  { %1422 = vsyncpa [#allocation7], 1 }
 0x465   :  { %1424 = vsyncpa [#allocation7 + $0x1], 1 }
 0x466   :  { %1425 = vsyncpa [#allocation5], 1 }
 0x467   :  { %1427 = vsyncpa [#allocation5 + $0x1], 1 }
 0x468   :  { %1428 = vsyncpa [#allocation10], 1 }

</bundles_post_ra>
